<compile_context>
chip_gen: v5e
topology: v5e:2x2
jax: 0.10.0
libtpu: 0.0.40
codegen_flags: <defaults>
</compile_context>

<pallas_src>
import math
import numpy as np
import jax
import jax.numpy as jnp
from jax import lax
from jax.experimental import pallas as pl
from jax.experimental.pallas import tpu as pltpu

# ----------------------------- configuration ------------------------------
B        = 2     # batch
SEQ_LEN  = 8     # L
PRED_LEN = 8     # P
T_OUT    = SEQ_LEN + PRED_LEN          # 16
ENC_IN   = 4     # M  (c_out == enc_in so de-normalization broadcasts as in torch)
C_OUT    = 4
D_MARK   = 4     # timeF features for freq='h'
D_MODEL  = 32
D_FF     = 32
D_BERT   = 768   # hard-coded pad target in the original forward
LANES    = 128

BL = B * SEQ_LEN                        # 16 stacked input rows
BP = B * PRED_LEN                       # 16 stacked output rows

assert D_FF == D_MODEL                  # head/tail split of the LayerNorm rewrite
assert C_OUT == ENC_IN                  # de-normalization broadcast (as in the torch model)
assert PRED_LEN == SEQ_LEN              # lets the per-batch stat rows line up 1:1 with output rows
assert ENC_IN + D_MARK <= LANES

INV_N  = 1.0 / D_BERT
N_TAIL = float(D_BERT - D_FF)           # 736 zero-padded lanes (only their bert_pe sums enter)

# ------------------- packed constant slab: row layout ----------------------
R_AAVG  = 0                             # (BL, BL)   block-diag per-batch 1/L averaging
R_AALL  = R_AAVG + BL                   # (3*BP, BL) stacked [Wp@S_prev ; Wp ; Wp@S_next] block-diag
R_W0T   = R_AALL + 3 * BP               # (D_MODEL, 128) conv tap 0 weight, transposed, lane-padded
R_W1T   = R_W0T + D_MODEL               # (D_MODEL, 128) conv tap 1 + timeF weight, transposed
R_W2T   = R_W1T + D_MODEL               # (D_MODEL, 128) conv tap 2 weight, transposed
R_CPRED = R_W2T + D_MODEL               # (BP, D_FF) folded constant; lanes C_S1/C_S2 = LN tail sums
C_S1    = D_FF
C_S2    = D_FF + 1
R_WOUT  = R_CPRED + BP                  # (D_FF, 128) gamma-scaled out_layer W (cols >= C_OUT zero)
R_BOUT  = R_WOUT + D_FF                 # row R_BOUT: beta-folded out_layer bias (cols >= C_OUT zero)
R_MASK  = R_BOUT + 1                    # row R_MASK: 1.0 in lanes < ENC_IN (normalize-these mask)
SLAB_ROWS = ((R_MASK + 1 + 7) // 8) * 8 # 216


# ------------------------------ Pallas kernel ------------------------------
def bert4ts_kernel(xm_ref, slab_ref, out_ref):
    X = xm_ref[...]                                              # (BL, 128): [x_enc | x_mark | 0]

    a_avg = slab_ref[R_AAVG:R_AAVG + BL, 0:BL]                   # (16, 16)
    a_all = slab_ref[R_AALL:R_AALL + 3 * BP, 0:BL]               # (48, 16)
    w0t   = slab_ref[R_W0T:R_W0T + D_MODEL, :]                   # (32, 128)
    w1t   = slab_ref[R_W1T:R_W1T + D_MODEL, :]                   # (32, 128)
    w2t   = slab_ref[R_W2T:R_W2T + D_MODEL, :]                   # (32, 128)
    cpred = slab_ref[R_CPRED:R_CPRED + BP, 0:D_FF]               # (16, 32)
    s1t   = slab_ref[R_CPRED:R_CPRED + BP, C_S1:C_S1 + 1]        # (16, 1)  sum(bert_pe tail)
    s2t   = slab_ref[R_CPRED:R_CPRED + BP, C_S2:C_S2 + 1]        # (16, 1)  sum(bert_pe tail^2)
    w_out = slab_ref[R_WOUT:R_WOUT + D_FF, :]                    # (32, 128) (cols >= C_OUT are 0)
    b_out = slab_ref[R_BOUT:R_BOUT + 1, :]                       # (1, 128)
    mask  = slab_ref[R_MASK:R_MASK + 1, :]                       # (1, 128)  1.0 in x_enc lanes

    # --- 1. per-(batch, channel) stats over the seq axis ---------------------------
    # The block-diagonal averaging matmul broadcasts the stats to every row of its
    # batch block, already lane-aligned with the output -> no `sel` scatter matmuls.
    mean_rows = jnp.dot(a_avg, X, preferred_element_type=jnp.float32)         # (16, 128)
    ex2_rows  = jnp.dot(a_avg, X * X, preferred_element_type=jnp.float32)     # (16, 128)
    var_rows  = jnp.maximum(ex2_rows - mean_rows * mean_rows, 0.0)            # unbiased=False
    std_rows  = jnp.sqrt(var_rows + 1e-5)
    x_norm    = (X - mean_rows) / std_rows
    # normalize only the x_enc lanes; x_mark lanes (and zero padding) pass through raw
    x_emb     = X + mask * (x_norm - X)                                       # (16, 128)

    # --- 2+3. conv(k=3, circular) + timeF linear + pos-emb + predict_linear --------
    # Time-mix: the circular shifts are folded into the predict_linear operator on the
    # host; all three tap operators are stacked into ONE matmul.
    y  = jnp.dot(a_all, x_emb, preferred_element_type=jnp.float32)            # (48, 128)
    dn = (((1,), (1,)), ((), ()))   # contract the lane axes (x @ W^T form)
    h  = (lax.dot_general(y[0:BP],         w0t, dimension_numbers=dn,
                          preferred_element_type=jnp.float32)
          + lax.dot_general(y[BP:2 * BP],  w1t, dimension_numbers=dn,
                            preferred_element_type=jnp.float32)
          + lax.dot_general(y[2 * BP:],    w2t, dimension_numbers=dn,
                            preferred_element_type=jnp.float32)
          + cpred)                                                            # (16, 32)

    # --- 4. LayerNorm(768) reduced to the D_FF consumed lanes ----------------------
    # full-row mean / variance reconstructed from the precomputed bert_pe tail sums:
    #   sum_tail (pe_tail - mu)^2 = s2t - 2*mu*s1t + n_tail*mu^2
    mu   = (jnp.sum(h, axis=1, keepdims=True) + s1t) * INV_N                  # (16, 1)
    d    = h - mu
    tail = s2t - 2.0 * mu * s1t + N_TAIL * mu * mu
    var2 = (jnp.sum(d * d, axis=1, keepdims=True) + tail) * INV_N
    hn   = d * lax.rsqrt(var2 + 1e-12)                                        # (16, 32)

    # --- 5. out_layer (gamma/beta pre-folded), de-normalize, lane-dense store ------
    # Output lanes >= C_OUT are discarded by the wrapper, so their garbage is harmless.
    o = jnp.dot(hn, w_out, preferred_element_type=jnp.float32) + b_out        # (16, 128)
    out_ref[...] = o * std_rows + mean_rows


# ------------------------------ wrapper ------------------------------------
@jax.jit
def bert4ts_forward(x_enc, x_mark_enc, slab):
    """x_enc: (B, L, M) f32, x_mark_enc: (B, L, D_MARK) f32 -> (B, PRED_LEN, C_OUT)"""
    Bq, L, M = x_enc.shape
    dmark = x_mark_enc.shape[-1]
    # merge the two data inputs into one lane-padded (B*L, 128) slab (one DMA)
    xm = jnp.concatenate([x_enc, x_mark_enc], axis=-1).reshape(Bq * L, M + dmark)
    xm = jnp.pad(xm, ((0, 0), (0, LANES - (M + dmark))))

    out = pl.pallas_call(
        bert4ts_kernel,
        out_shape=jax.ShapeDtypeStruct((Bq * PRED_LEN, LANES), jnp.float32),
        grid_spec=pltpu.PrefetchScalarGridSpec(
            num_scalar_prefetch=0,
            grid=(1,),                                             # whole batch in one step
            in_specs=[
                pl.BlockSpec((Bq * L, LANES),       lambda i: (0, 0)),   # merged x / x_mark
                pl.BlockSpec((SLAB_ROWS, LANES),    lambda i: (0, 0)),   # packed constants
            ],
            out_specs=pl.BlockSpec((Bq * PRED_LEN, LANES), lambda i: (0, 0)),
        ),
        compiler_params=pltpu.CompilerParams(dimension_semantics=("arbitrary",)),
    )(xm, slab)

    # lane-dense slab -> (B, pred_len, c_out)
    return out.reshape(Bq, PRED_LEN, LANES)[:, :, :C_OUT]


# ------------------------- host-side constant folding -----------------------
def pack_params(p):
    """Fold + pack all constants into one lane-dense (SLAB_ROWS, 128) f32 slab."""
    f64 = lambda a: np.asarray(a, dtype=np.float64)
    w_conv  = f64(p["w_conv"]);  w_temp = f64(p["w_temp"]);  pe    = f64(p["pe"])
    w_pred  = f64(p["w_pred"]);  b_pred = f64(p["b_pred"])
    bert_pe = f64(p["bert_pe"]); gamma  = f64(p["gamma"]);   beta  = f64(p["beta"])
    w_out   = f64(p["w_out"]);   b_out  = f64(p["b_out"])

    slab = np.zeros((SLAB_ROWS, LANES), np.float64)

    # circular-shift matrices of the k=3 Conv1d (row t picks x[t-1] / x[t+1])
    idx = np.arange(SEQ_LEN)
    s_prev = np.zeros((SEQ_LEN, SEQ_LEN)); s_prev[idx, (idx - 1) % SEQ_LEN] = 1.0
    s_next = np.zeros((SEQ_LEN, SEQ_LEN)); s_next[idx, (idx + 1) % SEQ_LEN] = 1.0

    # predict_linear restricted to the PRED_LEN rows the model actually returns
    wp = w_pred[SEQ_LEN:, :]                                   # (P, L)
    bp = b_pred[SEQ_LEN:, :]                                   # (P, 1)

    def bdiag(m):                                              # (r, c) -> (B*r, B*c)
        r, c = m.shape
        out = np.zeros((B * r, B * c))
        for b in range(B):
            out[b * r:(b + 1) * r, b * c:(b + 1) * c] = m
        return out

    # block-diag per-batch averaging over seq (mean / E[x^2], broadcast to rows)
    slab[R_AAVG:R_AAVG + BL, 0:BL] = bdiag(np.full((SEQ_LEN, SEQ_LEN), 1.0 / SEQ_LEN))

    # fused time-mix operators: predict_linear composed with the conv-tap shifts
    slab[R_AALL           :R_AALL + BP,     0:BL] = bdiag(wp @ s_prev)
    slab[R_AALL + BP      :R_AALL + 2 * BP, 0:BL] = bdiag(wp)
    slab[R_AALL + 2 * BP  :R_AALL + 3 * BP, 0:BL] = bdiag(wp @ s_next)

    # channel-mix weights, transposed & lane-padded: rows = d_model, lanes = input lane
    slab[R_W0T:R_W0T + D_MODEL, 0:ENC_IN] = w_conv[0].T
    slab[R_W1T:R_W1T + D_MODEL, 0:ENC_IN] = w_conv[1].T
    slab[R_W1T:R_W1T + D_MODEL, ENC_IN:ENC_IN + D_MARK] = w_temp.T
    slab[R_W2T:R_W2T + D_MODEL, 0:ENC_IN] = w_conv[2].T

    # sinusoidal PE, predict-linear bias and bert_pe head folded into one constant;
    # the 736 zero-padded tail lanes enter only via their (per-row) sums
    cpred = wp @ pe + bp + bert_pe[SEQ_LEN:, :D_FF]            # (P, D_FF)
    slab[R_CPRED:R_CPRED + BP, 0:D_FF] = np.tile(cpred, (B, 1))
    slab[R_CPRED:R_CPRED + BP, C_S1] = np.tile(np.sum(bert_pe[SEQ_LEN:, D_FF:], axis=1), B)
    slab[R_CPRED:R_CPRED + BP, C_S2] = np.tile(np.sum(bert_pe[SEQ_LEN:, D_FF:] ** 2, axis=1), B)

    # LayerNorm affine folded into the out_layer (lanes >= C_OUT stay zero)
    slab[R_WOUT:R_WOUT + D_FF, 0:C_OUT] = gamma[0, :D_FF, None] * w_out
    slab[R_BOUT, 0:C_OUT] = (beta[:, :D_FF] @ w_out + b_out)[0]

    # channel mask: lanes carrying x_enc get normalized, everything else passes raw
    slab[R_MASK, 0:ENC_IN] = 1.0

    return jnp.asarray(slab, dtype=jnp.float32)


# --------------------------- pure-JAX reference -----------------------------
def bert4ts_reference(x_enc, x_mark_enc, p):
    mean = jnp.mean(x_enc, axis=1, keepdims=True)
    xc = x_enc - mean
    std = jnp.sqrt(jnp.mean(xc * xc, axis=1, keepdims=True) + 1e-5)
    xn = xc / std
    x_prev = jnp.roll(xn, 1, axis=1)
    x_next = jnp.roll(xn, -1, axis=1)
    tok = (x_prev @ p["w_conv"][0] + xn @ p["w_conv"][1] + x_next @ p["w_conv"][2])
    emb = tok + x_mark_enc @ p["w_temp"] + p["pe"][None]
    pred = jnp.einsum("tl,bld->btd", p["w_pred"], emb) + p["b_pred"][None]
    h = jnp.pad(pred, ((0, 0), (0, 0), (0, D_BERT - D_MODEL))) + p["bert_pe"][None]
    mu = jnp.mean(h, axis=-1, keepdims=True)
    hv = h - mu
    hn = hv * jax.lax.rsqrt(jnp.mean(hv * hv, axis=-1, keepdims=True) + 1e-12)
    hn = hn * p["gamma"] + p["beta"]
    out = hn[:, :, :D_FF] @ p["w_out"] + p["b_out"]
    out = out * std + mean
    return out[:, -PRED_LEN:, :]


# ------------------------------ param init ----------------------------------
def make_params(key):
    ks = jax.random.split(key, 8)
    def rnd(k, shape, scale=0.05):
        return (scale * jax.random.normal(k, shape)).astype(jnp.float32)

    # fixed sinusoidal positional embedding (L, D_MODEL)
    pos = np.arange(SEQ_LEN)[:, None].astype(np.float64)
    div = np.exp(np.arange(0, D_MODEL, 2).astype(np.float64)
                 * -(math.log(10000.0) / D_MODEL))
    pe = np.zeros((SEQ_LEN, D_MODEL), np.float32)
    pe[:, 0::2] = np.sin(pos * div)
    pe[:, 1::2] = np.cos(pos * div)

    bert_pos = rnd(ks[4], (T_OUT, D_BERT), 0.02)
    tok_type = rnd(ks[5], (1, D_BERT), 0.02)

    return {
        "w_conv":  rnd(ks[0], (3, ENC_IN, D_MODEL)),            # conv k=3, in->out
        "w_temp":  rnd(ks[1], (D_MARK, D_MODEL)),               # timeF linear (no bias)
        "pe":      jnp.asarray(pe),
        "w_pred":  rnd(ks[2], (T_OUT, SEQ_LEN)),                # Linear(seq_len, T)
        "b_pred":  rnd(ks[3], (T_OUT, 1)),
        "bert_pe": bert_pos + tok_type,                         # pos emb + token-type(0)
        "gamma":   (1.0 + rnd(ks[6], (1, D_BERT), 0.01)),
        "beta":    rnd(ks[6], (1, D_BERT), 0.01),
        "w_out":   rnd(ks[7], (D_FF, C_OUT)),
        "b_out":   rnd(ks[7], (1, C_OUT)),
    }
    # TODO(synk): BERT encoder layers are intentionally omitted — the original
    # forecast() consumes hidden_states[0], which is the embedding output and
    # is independent of the encoder layers.


# ---------------------------------- main -------------------------------------
if __name__ == "__main__":
    key = jax.random.PRNGKey(0)
    k_x, k_m, k_p = jax.random.split(key, 3)

    x_enc = jax.random.normal(k_x, (B, SEQ_LEN, ENC_IN), dtype=jnp.float32)
    x_mark = jax.random.normal(k_m, (B, SEQ_LEN, D_MARK), dtype=jnp.float32)
    params = make_params(k_p)
    slab = pack_params(params)

    out = jax.block_until_ready(bert4ts_forward(x_enc, x_mark, slab))
    ref = jax.block_until_ready(bert4ts_reference(x_enc, x_mark, params))

    assert out.shape == (B, PRED_LEN, C_OUT), out.shape
    np.testing.assert_allclose(np.asarray(out), np.asarray(ref), rtol=1e-3, atol=1e-3)

    print("KERNEL_OK")
</pallas_src>

<mosaic_0001>
module attributes {stable_mosaic.version = 11 : i64} {
  func.func @bert4ts_kernel(%arg0: i32, %arg1: memref<16x128xf32, #tpu.memory_space<vmem>>, %arg2: memref<216x128xf32, #tpu.memory_space<vmem>>, %arg3: memref<16x128xf32, #tpu.memory_space<vmem>>) attributes {dimension_semantics = [#tpu.dimension_semantics<arbitrary>], iteration_bounds = array<i64: 1>, scalar_prefetch = 0 : i64, scratch_operands = 0 : i64, tpu.core_type = #tpu.core_type<tc>, window_params = [{pipeline_mode = #tpu.pipeline_mode<synchronous>, transform_indices = @transform_0, window_bounds = array<i64: 16, 128>}, {pipeline_mode = #tpu.pipeline_mode<synchronous>, transform_indices = @transform_1, window_bounds = array<i64: 216, 128>}, {pipeline_mode = #tpu.pipeline_mode<synchronous>, transform_indices = @transform_2, window_bounds = array<i64: 16, 128>}]} {
    %c0 = arith.constant 0 : index
    %c0_0 = arith.constant 0 : index
    %0 = vector.load %arg1[%c0, %c0_0] : memref<16x128xf32, #tpu.memory_space<vmem>>, vector<16x128xf32>
    %c0_1 = arith.constant 0 : index
    %c0_2 = arith.constant 0 : index
    %1 = vector.load %arg2[%c0_1, %c0_2] : memref<216x128xf32, #tpu.memory_space<vmem>>, vector<16x16xf32>
    %c16 = arith.constant 16 : index
    %c0_3 = arith.constant 0 : index
    %2 = vector.load %arg2[%c16, %c0_3] : memref<216x128xf32, #tpu.memory_space<vmem>>, vector<48x16xf32>
    %c64 = arith.constant 64 : index
    %c0_4 = arith.constant 0 : index
    %3 = vector.load %arg2[%c64, %c0_4] : memref<216x128xf32, #tpu.memory_space<vmem>>, vector<32x128xf32>
    %c96 = arith.constant 96 : index
    %c0_5 = arith.constant 0 : index
    %4 = vector.load %arg2[%c96, %c0_5] : memref<216x128xf32, #tpu.memory_space<vmem>>, vector<32x128xf32>
    %c128 = arith.constant 128 : index
    %c0_6 = arith.constant 0 : index
    %5 = vector.load %arg2[%c128, %c0_6] : memref<216x128xf32, #tpu.memory_space<vmem>>, vector<32x128xf32>
    %c160 = arith.constant 160 : index
    %c0_7 = arith.constant 0 : index
    %6 = vector.load %arg2[%c160, %c0_7] : memref<216x128xf32, #tpu.memory_space<vmem>>, vector<16x32xf32>
    %c160_8 = arith.constant 160 : index
    %c32 = arith.constant 32 : index
    %7 = vector.load %arg2[%c160_8, %c32] : memref<216x128xf32, #tpu.memory_space<vmem>>, vector<16x1xf32>
    %c160_9 = arith.constant 160 : index
    %c33 = arith.constant 33 : index
    %8 = vector.load %arg2[%c160_9, %c33] : memref<216x128xf32, #tpu.memory_space<vmem>>, vector<16x1xf32>
    %c176 = arith.constant 176 : index
    %c0_10 = arith.constant 0 : index
    %9 = vector.load %arg2[%c176, %c0_10] : memref<216x128xf32, #tpu.memory_space<vmem>>, vector<32x128xf32>
    %c208 = arith.constant 208 : index
    %c0_11 = arith.constant 0 : index
    %10 = vector.load %arg2[%c208, %c0_11] : memref<216x128xf32, #tpu.memory_space<vmem>>, vector<1x128xf32>
    %c209 = arith.constant 209 : index
    %c0_12 = arith.constant 0 : index
    %11 = vector.load %arg2[%c209, %c0_12] : memref<216x128xf32, #tpu.memory_space<vmem>>, vector<1x128xf32>
    %cst = arith.constant dense<0.000000e+00> : vector<16x128xf32>
    %12 = tpu.matmul %1, %0, %cst {dimension_numbers = #tpu.dot_dimension_numbers<[1], [0], [0], [1], [0, 0, 1, 1], [], []>} : vector<16x16xf32>, vector<16x128xf32>, vector<16x128xf32> -> vector<16x128xf32>
    %13 = arith.mulf %0, %0 : vector<16x128xf32>
    %cst_13 = arith.constant dense<0.000000e+00> : vector<16x128xf32>
    %14 = tpu.matmul %1, %13, %cst_13 {dimension_numbers = #tpu.dot_dimension_numbers<[1], [0], [0], [1], [0, 0, 1, 1], [], []>} : vector<16x16xf32>, vector<16x128xf32>, vector<16x128xf32> -> vector<16x128xf32>
    %15 = arith.mulf %12, %12 : vector<16x128xf32>
    %16 = arith.subf %14, %15 : vector<16x128xf32>
    %cst_14 = arith.constant 0.000000e+00 : f32
    %17 = vector.broadcast %cst_14 : f32 to vector<16x128xf32>
    %18 = arith.maximumf %16, %17 : vector<16x128xf32>
    %cst_15 = arith.constant 9.99999974E-6 : f32
    %19 = vector.broadcast %cst_15 : f32 to vector<16x128xf32>
    %20 = arith.addf %18, %19 : vector<16x128xf32>
    %21 = math.sqrt %20 : vector<16x128xf32>
    %22 = arith.subf %0, %12 : vector<16x128xf32>
    %23 = arith.divf %22, %21 : vector<16x128xf32>
    %24 = arith.subf %23, %0 : vector<16x128xf32>
    %25 = vector.broadcast %11 : vector<1x128xf32> to vector<16x128xf32>
    %26 = arith.mulf %25, %24 : vector<16x128xf32>
    %27 = arith.addf %0, %26 : vector<16x128xf32>
    %cst_16 = arith.constant dense<0.000000e+00> : vector<48x128xf32>
    %28 = tpu.matmul %2, %27, %cst_16 {dimension_numbers = #tpu.dot_dimension_numbers<[1], [0], [0], [1], [0, 0, 1, 1], [], []>} : vector<48x16xf32>, vector<16x128xf32>, vector<48x128xf32> -> vector<48x128xf32>
    %29 = vector.extract_strided_slice %28 {offsets = [0, 0], sizes = [16, 128], strides = [1, 1]} : vector<48x128xf32> to vector<16x128xf32>
    %cst_17 = arith.constant dense<0.000000e+00> : vector<16x32xf32>
    %30 = tpu.matmul %29, %3, %cst_17 {dimension_numbers = #tpu.dot_dimension_numbers<[1], [1], [0], [0], [0, 0, 1, 0], [], []>} : vector<16x128xf32>, vector<32x128xf32>, vector<16x32xf32> -> vector<16x32xf32>
    %31 = vector.extract_strided_slice %28 {offsets = [16, 0], sizes = [16, 128], strides = [1, 1]} : vector<48x128xf32> to vector<16x128xf32>
    %cst_18 = arith.constant dense<0.000000e+00> : vector<16x32xf32>
    %32 = tpu.matmul %31, %4, %cst_18 {dimension_numbers = #tpu.dot_dimension_numbers<[1], [1], [0], [0], [0, 0, 1, 0], [], []>} : vector<16x128xf32>, vector<32x128xf32>, vector<16x32xf32> -> vector<16x32xf32>
    %33 = arith.addf %30, %32 : vector<16x32xf32>
    %34 = vector.extract_strided_slice %28 {offsets = [32, 0], sizes = [16, 128], strides = [1, 1]} : vector<48x128xf32> to vector<16x128xf32>
    %cst_19 = arith.constant dense<0.000000e+00> : vector<16x32xf32>
    %35 = tpu.matmul %34, %5, %cst_19 {dimension_numbers = #tpu.dot_dimension_numbers<[1], [1], [0], [0], [0, 0, 1, 0], [], []>} : vector<16x128xf32>, vector<32x128xf32>, vector<16x32xf32> -> vector<16x32xf32>
    %36 = arith.addf %33, %35 : vector<16x32xf32>
    %37 = arith.addf %36, %6 : vector<16x32xf32>
    %cst_20 = arith.constant dense<0.000000e+00> : vector<16xf32>
    %38 = vector.multi_reduction <add>, %37, %cst_20 [1] : vector<16x32xf32> to vector<16xf32>
    %39 = vector.shape_cast %38 : vector<16xf32> to vector<16x1xf32>
    %40 = arith.addf %39, %7 : vector<16x1xf32>
    %cst_21 = arith.constant 0.00130208337 : f32
    %41 = vector.broadcast %cst_21 : f32 to vector<16x1xf32>
    %42 = arith.mulf %40, %41 : vector<16x1xf32>
    %43 = vector.broadcast %42 : vector<16x1xf32> to vector<16x32xf32>
    %44 = arith.subf %37, %43 : vector<16x32xf32>
    %cst_22 = arith.constant 2.000000e+00 : f32
    %45 = vector.broadcast %cst_22 : f32 to vector<16x1xf32>
    %46 = arith.mulf %45, %42 : vector<16x1xf32>
    %47 = arith.mulf %46, %7 : vector<16x1xf32>
    %48 = arith.subf %8, %47 : vector<16x1xf32>
    %cst_23 = arith.constant 7.360000e+02 : f32
    %49 = vector.broadcast %cst_23 : f32 to vector<16x1xf32>
    %50 = arith.mulf %49, %42 : vector<16x1xf32>
    %51 = arith.mulf %50, %42 : vector<16x1xf32>
    %52 = arith.addf %48, %51 : vector<16x1xf32>
    %53 = arith.mulf %44, %44 : vector<16x32xf32>
    %cst_24 = arith.constant dense<0.000000e+00> : vector<16xf32>
    %54 = vector.multi_reduction <add>, %53, %cst_24 [1] : vector<16x32xf32> to vector<16xf32>
    %55 = vector.shape_cast %54 : vector<16xf32> to vector<16x1xf32>
    %56 = arith.addf %55, %52 : vector<16x1xf32>
    %cst_25 = arith.constant 0.00130208337 : f32
    %57 = vector.broadcast %cst_25 : f32 to vector<16x1xf32>
    %58 = arith.mulf %56, %57 : vector<16x1xf32>
    %cst_26 = arith.constant 9.99999996E-13 : f32
    %59 = vector.broadcast %cst_26 : f32 to vector<16x1xf32>
    %60 = arith.addf %58, %59 : vector<16x1xf32>
    %61 = math.rsqrt %60 : vector<16x1xf32>
    %62 = vector.broadcast %61 : vector<16x1xf32> to vector<16x32xf32>
    %63 = arith.mulf %44, %62 : vector<16x32xf32>
    %cst_27 = arith.constant dense<0.000000e+00> : vector<16x128xf32>
    %64 = tpu.matmul %63, %9, %cst_27 {dimension_numbers = #tpu.dot_dimension_numbers<[1], [0], [0], [1], [0, 0, 1, 1], [], []>} : vector<16x32xf32>, vector<32x128xf32>, vector<16x128xf32> -> vector<16x128xf32>
    %65 = vector.broadcast %10 : vector<1x128xf32> to vector<16x128xf32>
    %66 = arith.addf %64, %65 : vector<16x128xf32>
    %67 = arith.mulf %66, %21 : vector<16x128xf32>
    %68 = arith.addf %67, %12 : vector<16x128xf32>
    %c0_28 = arith.constant 0 : index
    %c0_29 = arith.constant 0 : index
    %69 = vector.load %arg3[%c0_28, %c0_29] : memref<16x128xf32, #tpu.memory_space<vmem>>, vector<16x128xf32>
    tpu.vector_store %arg3[%c0_28, %c0_29], %68 {strides = array<i32>} : memref<16x128xf32, #tpu.memory_space<vmem>>, vector<16x128xf32>,
    return
  }
  func.func @transform_0(%arg0: i32) -> (i32, i32) {
    %c0_i32 = arith.constant 0 : i32
    %c0_i32_0 = arith.constant 0 : i32
    %c0_i32_1 = arith.constant 0 : i32
    return %c0_i32, %c0_i32_0 : i32, i32
  }
  func.func @transform_1(%arg0: i32) -> (i32, i32) {
    %c0_i32 = arith.constant 0 : i32
    %c0_i32_0 = arith.constant 0 : i32
    %c0_i32_1 = arith.constant 0 : i32
    return %c0_i32, %c0_i32_0 : i32, i32
  }
  func.func @transform_2(%arg0: i32) -> (i32, i32) {
    %c0_i32 = arith.constant 0 : i32
    %c0_i32_0 = arith.constant 0 : i32
    %c0_i32_1 = arith.constant 0 : i32
    return %c0_i32, %c0_i32_0 : i32, i32
  }
}

</mosaic_0001>

<bundles_post_ra>
// kernel: bert4ts_forward.1
= control target key start
LH: loop header
LB: loop body
LE: loop exit
PB: predicated region body
PF: predicated region fallthrough
CT: control target
= control target key end

     0   :  { %7 = vsyncpa [#allocation3], 0  ;;  %s509_s12 = smov [#allocation2]   ;;  %s510_s14 = smov 128   ;;  %s605_s0 = inlined_call_operand.vmem [shape: f32[16,128], index: 0, kind: input, shape index: {}]   ;;  %s606_s1 = inlined_call_operand.hbm [shape: f32[216,128], index: 1, kind: input, shape index: {}]   ;;  %s607_s2 = inlined_call_operand.vmem [shape: f32[16,128], index: 2, kind: output, shape index: {}]  }
   0x1   :  { %s14_s11 = sshll.u32 %s606_s1, 4  ;;  %s16_s13 = sshll.u32 %s509_s12, 4  ;;  %s15_s11 = int_to_ptr.hbm [resolvable:$true] %s14_s11  ;;  %s17_s13 = int_to_ptr.vmem [resolvable:$true] %s16_s13 }
   0x2   :  { %s511_s15 = smov 8  }
   0x3   :  { %22 = dma.hbm_to_vmem [thread:$0]  %s15_s11, 3456, %s17_s13, [#allocation3], %s510_s14, %s510_s14, %s511_s15  }
   0x4   :  { %507 = dma.done.wait [#allocation3], 3456  }
   0x5   :  { %508 = vsyncadd [#allocation3], 4294963840  ;;  %v536_v0 = vld [vmem:[%s605_s0 + $0x8] sm:$0xff]  ;;  %v541_v1 = vld [vmem:[%s605_s0] sm:$0xff]  ;;  %vm57_vm0 = vcmask 130048   ;;  %vm309_vm13 = vcmask 261120  }
   0x6   :  { %78 = vmatpush.msra.mxu0 %v536_v0  ;;  %v88_v2 = vmul.f32 %v536_v0, %v536_v0  ;;  %v29_v3 = vld [vmem:[#allocation2] sm:$0xff]  ;;  %v87_v4 = vmul.f32 %v541_v1, %v541_v1  ;;  %v30_v5 = vld [vmem:[#allocation2 + $0x8] sm:$0xff]  ;;  %v469_v62 = vld [vmem:[#allocation2 + $0xd1] ss:$0 sm:$0xff]  ;;  %s513_s0 = smov 1  }
   0x8   :  { %79 = vmatpush.msra.mxu0 %v541_v1  ;;  %103 = vmatpush.msra.mxu1 %v88_v2 }
   0x9   :  { %447 = vmatmul.msk.f32.vlgmr.msra.gmra.mxu0 %vm57_vm0, %v29_v3 }
   0xa   :  { %104 = vmatpush.msra.mxu1 %v87_v4 }
   0xb   :  { %449 = vmatmul.msk.f32.vlgmr.msra.gmra.mxu1 %vm57_vm0, %v29_v3 }
  0x11   :  { %448 = vmatmul.msk.f32.gmra.mxu0 %vm57_vm0, %v30_v5 }
  0x13   :  { %450 = vmatmul.msk.f32.gmra.mxu1 %vm57_vm0, %v30_v5 }
  0x86   :  { %v553_v6 = vpop.f32.mrf.mxu0 }
  0x87   :  { %v112_v7 = vmul.f32 %v553_v6, %v553_v6  ;;  %v144_v52 = vsub.f32 %v541_v1, %v553_v6 }
  0x88   :  { %v106_v8 = vpop.f32.mrf.mxu1 }
  0x89   :  { %v114_v9 = vsub.f32 %v106_v8, %v112_v7  ;;  %v31_v8 = vld [vmem:[#allocation2 + $0x10] sm:$0xff] }
  0x8b   :  { %v116_v10 = vmax.f32 %v114_v9, 0.0  ;;  %v32_v9 = vld [vmem:[#allocation2 + $0x18] sm:$0xff] }
  0x8d   :  { %v118_v11 = vadd.f32 1e-05, %v116_v10  ;;  %v40_v10 = vld [vmem:[#allocation2 + $0x58] sm:$0xff] }
  0x8e   :  { %v557_v12 = vpop.f32.mrf.mxu0  ;;  %271 = vmatpush.xpose.msrb.mxu0 %v40_v10 }
  0x8f   :  { %471 = vrsqrt.f32 %v118_v11  ;;  %v113_v13 = vmul.f32 %v557_v12, %v557_v12  ;;  %vm127_vm1 = vcmp.eq.f32.partialorder %v118_v11, inf  ;;  %v130_v28 = vand.u32 2147483648, %v118_v11 }
  0x90   :  { %v109_v14 = vpop.f32.mrf.mxu1  ;;  %vm129_vm2 = vcmp.eq.f32.partialorder %v118_v11, 0.0  ;;  %v145_v58 = vsub.f32 %v536_v0, %v557_v12 }
  0x91   :  { %v115_v15 = vsub.f32 %v109_v14, %v113_v13  ;;  %v33_v13 = vld [vmem:[#allocation2 + $0x20] sm:$0xff]  ;;  %v38_v14 = vld [vmem:[#allocation2 + $0x48] sm:$0xff] }
  0x93   :  { %v117_v16 = vmax.f32 %v115_v15, 0.0  ;;  %v34_v15 = vld [vmem:[#allocation2 + $0x28] sm:$0xff] }
  0x95   :  { %v472_v17 = vpop.eup %471  ;;  %v119_v18 = vadd.f32 1e-05, %v117_v16  ;;  %v36_v16 = vld [vmem:[#allocation2 + $0x38] sm:$0xff] }
  0x96   :  { %v121_v19 = vmul.f32 %v472_v17, %v118_v11 }
  0x97   :  { %473 = vrsqrt.f32 %v119_v18  ;;  %vm139_vm3 = vcmp.eq.f32.partialorder %v119_v18, inf  ;;  %v142_v35 = vand.u32 2147483648, %v119_v18  ;;  %vm141_vm4 = vcmp.eq.f32.partialorder %v119_v18, 0.0 }
  0x98   :  { %v122_v20 = vmul.f32 %v472_v17, %v121_v19  ;;  %v42_v19 = vld [vmem:[#allocation2 + $0x68] sm:$0xff] }
  0x9a   :  { %v123_v21 = vmul.f32 0.5, %v122_v20  ;;  %v41_v20 = vld [vmem:[#allocation2 + $0x60] sm:$0xff] }
  0x9c   :  { %v124_v22 = vsub.f32 1.5, %v123_v21  ;;  %v48_v21 = vld [vmem:[#allocation2 + $0x98] sm:$0xff] }
  0x9d   :  { %v474_v23 = vpop.eup %473  ;;  %294 = vmatpush.xpose.msrb.mxu1 %v48_v21 }
  0x9e   :  { %v125_v24 = vmul.f32 %v472_v17, %v124_v22  ;;  %v133_v25 = vmul.f32 %v474_v23, %v119_v18  ;;  %v44_v17 = vld [vmem:[#allocation2 + $0x78] sm:$0xff]  ;;  %v47_v22 = vld [vmem:[#allocation2 + $0x90] sm:$0xff] }
  0x9f   :  { %248 = vmatpush.xpose.msra.mxu3 %v44_v17 }
  0xa0   :  { %v126_v26 = vmul.f32 %v125_v24, %v118_v11  ;;  %v134_v27 = vmul.f32 %v474_v23, %v133_v25  ;;  %v45_v24 = vld [vmem:[#allocation2 + $0x80] sm:$0xff] }
  0xa1   :  { %295 = vmatpush.xpose.msrb.mxu1 %v47_v22 }
  0xa2   :  { %v135_v29 = vmul.f32 0.5, %v134_v27  ;;  %v128_v30 = vsel %vm127_vm1, %v118_v11, %v126_v26  ;;  %v39_v11 = vld [vmem:[#allocation2 + $0x50] sm:$0xff] }
  0xa3   :  { %v561_v31 = vsel %vm129_vm2, %v130_v28, %v128_v30  ;;  %272 = vmatpush.xpose.msrb.mxu0 %v39_v11 }
  0xa4   :  { %v136_v32 = vsub.f32 1.5, %v135_v29  ;;  %475 = vrcp.f32 %v561_v31  ;;  %v157_v42 = vand.u32 2147483648, %v561_v31  ;;  %vm151_vm6 = vweird.f32 %v561_v31 }
  0xa5   :  { %v155_v44 = vand.u32 2147483647, %v561_v31 }
  0xa6   :  { %v137_v33 = vmul.f32 %v474_v23, %v136_v32  ;;  %v158_v48 = vor.u32 1.1754944e-38, %v157_v42  ;;  %v46_v23 = vld [vmem:[#allocation2 + $0x88] sm:$0xff] }
  0xa7   :  { %vm156_vm8 = vcmp.eq.f32.partialorder %v155_v44, 8.507059e+37  ;;  %273 = vmatpush.xpose.msrb.mxu0 %v38_v14  ;;  %296 = vmatpush.xpose.msrb.mxu1 %v46_v23 }
  0xa8   :  { %v138_v34 = vmul.f32 %v137_v33, %v119_v18 }
  0xaa   :  { %v476_v36 = vpop.eup %475  ;;  %v140_v37 = vsel %vm139_vm3, %v119_v18, %v138_v34  ;;  %v43_v18 = vld [vmem:[#allocation2 + $0x70] sm:$0xff] }
  0xab   :  { %v564_v38 = vsel %vm141_vm4, %v142_v35, %v140_v37  ;;  %v147_v39 = vmul.f32 %v476_v36, %v561_v31  ;;  %vm152_vm5 = vweird.f32 %v476_v36  ;;  %249 = vmatpush.xpose.msra.mxu3 %v43_v18  ;;  %297 = vmatpush.xpose.msrb.mxu1 %v45_v24 }
  0xac   :  { %477 = vrcp.f32 %v564_v38  ;;  %vm153_vm7 = vmor %vm151_vm6, %vm152_vm5  ;;  %v172_v50 = vand.u32 2147483648, %v564_v38  ;;  %v170_v54 = vand.u32 2147483647, %v564_v38  ;;  %vm166_vm10 = vweird.f32 %v564_v38 }
  0xad   :  { %v148_v40 = vsub.f32 1.0, %v147_v39 }
  0xae   :  { %v173_v57 = vor.u32 1.1754944e-38, %v172_v50  ;;  %vm171_vm12 = vcmp.eq.f32.partialorder %v170_v54, 8.507059e+37 }
  0xaf   :  { %v149_v41 = vmul.f32 %v476_v36, %v148_v40  ;;  %250 = vmatpush.xpose.msra.mxu3 %v42_v19 }
  0xb1   :  { %v150_v43 = vadd.f32 %v476_v36, %v149_v41 }
  0xb2   :  { %v478_v45 = vpop.eup %477 }
  0xb3   :  { %v162_v46 = vmul.f32 %v478_v45, %v564_v38  ;;  %v154_v47 = vsel %vm153_vm7, %v476_v36, %v150_v43  ;;  %vm167_vm9 = vweird.f32 %v478_v45  ;;  %251 = vmatpush.xpose.msra.mxu3 %v41_v20  ;;  %v49_v36 = vld [vmem:[#allocation2 + $0xa0] sm:$0xff] }
  0xb4   :  { %v159_v51 = vsel %vm156_vm8, %v158_v48, %v154_v47  ;;  %vm168_vm11 = vmor %vm166_vm10, %vm167_vm9 }
  0xb5   :  { %v163_v49 = vsub.f32 1.0, %v162_v46  ;;  %v160_v56 = vmul.f32 %v159_v51, %v144_v52 }
  0xb7   :  { %v164_v53 = vmul.f32 %v478_v45, %v163_v49  ;;  %v176_v63 = vsub.f32 %v160_v56, %v541_v1  ;;  %v512_v49 = vmov 32  }
  0xb8   :  { %465 = vset.pattern.permute.xlu1 %v512_v49 }
  0xb9   :  { %v165_v55 = vadd.f32 %v478_v45, %v164_v53  ;;  %v179_v4 = vmul.f32 %v469_v62, %v176_v63 }
  0xbb   :  { %v169_v59 = vsel %vm168_vm11, %v478_v45, %v165_v55  ;;  %v181_v7 = vadd.f32 %v179_v4, %v541_v1  ;;  %v35_v1 = vld [vmem:[#allocation2 + $0x30] sm:$0xff]  ;;  %v50_v45 = vld [vmem:[#allocation2 + $0xa8] sm:$0xff] }
  0xbc   :  { %v174_v60 = vsel %vm171_vm12, %v173_v57, %v169_v59 }
  0xbd   :  { %v175_v61 = vmul.f32 %v174_v60, %v145_v58 }
  0xbf   :  { %v177_v2 = vsub.f32 %v175_v61, %v536_v0 }
  0xc1   :  { %v180_v3 = vmul.f32 %v469_v62, %v177_v2 }
  0xc3   :  { %v182_v5 = vadd.f32 %v180_v3, %v536_v0  ;;  %v37_v0 = vld [vmem:[#allocation2 + $0x40] sm:$0xff] }
  0xc4   :  { %274 = vmatpush.xpose.msrb.mxu0 %v37_v0 }
  0xc5   :  { %215 = vmatpush.msra.mxu2 %v182_v5 }
  0xc7   :  { %216 = vmatpush.msra.mxu2 %v181_v7 }
  0xc8   :  { %451 = vmatmul.msk.f32.vlgmr.msra.gmra.mxu2 %vm57_vm0, %v31_v8 }
  0xd0   :  { %452 = vmatmul.msk.f32.gmra.mxu2 %vm57_vm0, %v32_v9 }
  0xd8   :  { %453 = vmatmul.msk.f32.gmra.mxu2 %vm57_vm0, %v33_v13  ;;  %v514_v13 = vmov 33  }
  0xd9   :  { %467 = vset.pattern.permute.xlu2 %v514_v13  ;;  %468 = vset.pattern.permute.xlu0 %v514_v13 }
  0xe0   :  { %454 = vmatmul.msk.f32.gmra.mxu2 %vm57_vm0, %v34_v15 }
  0xe8   :  { %455 = vmatmul.msk.f32.gmra.mxu2 %vm57_vm0, %v35_v1 }
  0xf0   :  { %456 = vmatmul.msk.f32.gmra.mxu2 %vm57_vm0, %v36_v16 }
 0x14b   :  { %v218_v25 = vpop.f32.mrf.mxu2 }
 0x14c   :  { %275 = vmatmul.f32.vlgmr.msrb.gmra.mxu0 %v218_v25 }
 0x153   :  { %v221_v26 = vpop.f32.mrf.mxu2 }
 0x154   :  { %278 = vmatmul.f32.gmra.mxu0 %v221_v26 }
 0x15b   :  { %v224_v27 = vpop.f32.mrf.mxu2 }
 0x15c   :  { %252 = vmatmul.f32.vlgmr.msra.gmra.mxu3 %v224_v27 }
 0x163   :  { %v227_v28 = vpop.f32.mrf.mxu2 }
 0x164   :  { %255 = vmatmul.f32.gmra.mxu3 %v227_v28 }
 0x16b   :  { %v230_v29 = vpop.f32.mrf.mxu2 }
 0x16c   :  { %298 = vmatmul.f32.vlgmr.msrb.gmra.mxu1 %v230_v29 }
 0x173   :  { %v233_v30 = vpop.f32.mrf.mxu2 }
 0x174   :  { %301 = vmatmul.f32.gmra.mxu1 %v233_v30 }
 0x1c9   :  { %v276_v33 = vpop.f32.mrf.mxu0 }
 0x1d1   :  { %v279_v42 = vpop.f32.mrf.mxu0 }
 0x1df   :  { %v253_v32 = vpop.f32.mrf.mxu3 }
 0x1e0   :  { %v277_v34 = vadd.f32 %v276_v33, %v253_v32 }
 0x1e7   :  { %v256_v40 = vpop.f32.mrf.mxu3 }
 0x1e8   :  { %v280_v43 = vadd.f32 %v279_v42, %v256_v40 }
 0x1e9   :  { %v299_v35 = vpop.f32.mrf.mxu1 }
 0x1ea   :  { %v305_v37 = vadd.f32 %v299_v35, %v277_v34 }
 0x1ec   :  { %v307_v39 = vadd.f32 %v305_v37, %v49_v36 }
 0x1ee   :  { %v310_v41 = vsel %vm309_vm13, %v307_v39, 0.0 }
 0x1ef   :  { %311 = vadd.xlane.f32.xlu0 %v310_v41 }
 0x1f1   :  { %v302_v44 = vpop.f32.mrf.mxu1 }
 0x1f2   :  { %v306_v46 = vadd.f32 %v302_v44, %v280_v43  ;;  %v54_v43 = vld [vmem:[#allocation2 + $0xc8] sm:$0xff]  ;;  %v53_v44 = vld [vmem:[#allocation2 + $0xc0] sm:$0xff] }
 0x1f3   :  { %425 = vmatpush.msrb.mxu3 %v54_v43 }
 0x1f4   :  { %v308_v47 = vadd.f32 %v306_v46, %v50_v45  ;;  %v51_v46 = vld [vmem:[#allocation2 + $0xb0] sm:$0xff] }
 0x1f5   :  { %426 = vmatpush.msrb.mxu3 %v53_v44 }
 0x1f6   :  { %v313_v48 = vsel %vm309_vm13, %v308_v47, 0.0 }
 0x1f7   :  { %314 = vadd.xlane.f32.xlu0 %v313_v48 }
 0x262   :  { %v312_v50 = vpop.xlane.xlu0 %311 }
 0x263   :  { %v316_v51 = vadd.f32 %v312_v50, %v49_v36 }
 0x265   :  { %v318_v52 = vmul.f32 0.0013020834, %v316_v51  ;;  %v470_v51 = vld [vmem:[#allocation2 + $0xd0] ss:$0 sm:$0xff] }
 0x267   :  { %322 = vperm.xlu1 %465, %v318_v52   ;;  %v332_v53 = vmul.f32 2.0, %v318_v52  ;;  %v346_v58 = vmul.f32 736.0, %v318_v52 }
 0x269   :  { %v334_v54 = vmul.f32 %v332_v53, %v49_v36  ;;  %v348_v59 = vmul.f32 %v346_v58, %v318_v52 }
 0x26a   :  { %v315_v55 = vpop.xlane.xlu0 %314 }
 0x26b   :  { %v317_v56 = vadd.f32 %v315_v55, %v50_v45  ;;  %338 = vrot.lane.b32.xlu2 %v334_v54, %s513_s0 }
 0x26d   :  { %v319_v57 = vmul.f32 0.0013020834, %v317_v56 }
 0x26f   :  { %327 = vperm.xlu1 %465, %v319_v57   ;;  %v333_v60 = vmul.f32 2.0, %v319_v57  ;;  %v347_v62 = vmul.f32 736.0, %v319_v57 }
 0x271   :  { %v335_v61 = vmul.f32 %v333_v60, %v50_v45  ;;  %v349_v63 = vmul.f32 %v347_v62, %v319_v57 }
 0x273   :  { %352 = vrot.lane.b32.xlu2 %v348_v59, %s513_s0 }
 0x277   :  { %340 = vrot.lane.b32.xlu1 %v335_v61, %s513_s0 }
 0x278   :  { %466 = vset.pattern.permute.xlu1 %v514_v13 }
 0x27b   :  { %354 = vrot.lane.b32.xlu2 %v349_v63, %s513_s0 }
 0x2c5   :  { %v339_v11 = vpop.permute.xlu2 %338 }
 0x2c6   :  { %v344_v0 = vsub.f32 %v49_v36, %v339_v11 }
 0x2cd   :  { %v353_v14 = vpop.permute.xlu2 %352 }
 0x2ce   :  { %v358_v15 = vadd.f32 %v353_v14, %v344_v0 }
 0x2d5   :  { %v355_v21 = vpop.permute.xlu2 %354 }
 0x2d9   :  { %v323_v2 = vpop.permute.xlu1 %322 }
 0x2da   :  { %v330_v3 = vsub.f32 %v307_v39, %v323_v2 }
 0x2dc   :  { %v360_v4 = vmul.f32 %v330_v3, %v330_v3 }
 0x2de   :  { %v362_v5 = vsel %vm309_vm13, %v360_v4, 0.0 }
 0x2df   :  { %363 = vadd.xlane.f32.xlu0 %v362_v5 }
 0x2e1   :  { %v328_v7 = vpop.permute.xlu1 %327 }
 0x2e2   :  { %v331_v8 = vsub.f32 %v308_v47, %v328_v7 }
 0x2e4   :  { %v361_v9 = vmul.f32 %v331_v8, %v331_v8 }
 0x2e6   :  { %v365_v10 = vsel %vm309_vm13, %v361_v9, 0.0 }
 0x2e7   :  { %366 = vadd.xlane.f32.xlu0 %v365_v10 }
 0x2e9   :  { %v341_v1 = vpop.permute.xlu1 %340 }
 0x2ea   :  { %v345_v18 = vsub.f32 %v50_v45, %v341_v1  ;;  %v52_v45 = vld [vmem:[#allocation2 + $0xb8] sm:$0xff] }
 0x2eb   :  { %427 = vmatpush.msrb.mxu3 %v52_v45 }
 0x2ec   :  { %v359_v22 = vadd.f32 %v355_v21, %v345_v18 }
 0x2ed   :  { %428 = vmatpush.msrb.mxu3 %v51_v46 }
 0x352   :  { %v364_v16 = vpop.xlane.xlu0 %363 }
 0x353   :  { %v368_v17 = vadd.f32 %v364_v16, %v358_v15 }
 0x355   :  { %v370_v19 = vmul.f32 0.0013020834, %v368_v17 }
 0x357   :  { %v372_v20 = vadd.f32 1e-12, %v370_v19 }
 0x359   :  { %479 = vrsqrt.f32 %v372_v20  ;;  %vm380_vm15 = vweird.f32 %v372_v20 }
 0x35a   :  { %v367_v23 = vpop.xlane.xlu0 %366 }
 0x35b   :  { %v369_v24 = vadd.f32 %v367_v23, %v359_v22 }
 0x35d   :  { %v371_v25 = vmul.f32 0.0013020834, %v369_v24 }
 0x35f   :  { %v480_v26 = vpop.eup %479  ;;  %v373_v27 = vadd.f32 1e-12, %v371_v25 }
 0x360   :  { %v375_v28 = vmul.f32 %v480_v26, %v372_v20  ;;  %vm381_vm14 = vweird.f32 %v480_v26 }
 0x361   :  { %481 = vrsqrt.f32 %v373_v27  ;;  %vm382_vm0 = vmor %vm380_vm15, %vm381_vm14  ;;  %vm390_vm2 = vweird.f32 %v373_v27 }
 0x362   :  { %v376_v29 = vmul.f32 %v480_v26, %v375_v28 }
 0x364   :  { %v377_v30 = vmul.f32 0.5, %v376_v29 }
 0x366   :  { %v378_v32 = vsub.f32 1.5, %v377_v30 }
 0x367   :  { %v482_v33 = vpop.eup %481 }
 0x368   :  { %v385_v34 = vmul.f32 %v482_v33, %v373_v27  ;;  %v379_v35 = vmul.f32 %v480_v26, %v378_v32  ;;  %vm391_vm1 = vweird.f32 %v482_v33 }
 0x369   :  { %vm392_vm3 = vmor %vm390_vm2, %vm391_vm1 }
 0x36a   :  { %v386_v36 = vmul.f32 %v482_v33, %v385_v34  ;;  %v383_v37 = vsel %vm382_vm0, %v480_v26, %v379_v35 }
 0x36b   :  { %396 = vperm.xlu1 %466, %v383_v37  }
 0x36c   :  { %v387_v39 = vmul.f32 0.5, %v386_v36 }
 0x36e   :  { %v388_v40 = vsub.f32 1.5, %v387_v39 }
 0x370   :  { %v389_v41 = vmul.f32 %v482_v33, %v388_v40 }
 0x372   :  { %v393_v42 = vsel %vm392_vm3, %v482_v33, %v389_v41 }
 0x373   :  { %401 = vperm.xlu2 %467, %v393_v42  }
 0x3cd   :  { %v402_v49 = vpop.permute.xlu2 %401 }
 0x3ce   :  { %v405_v50 = vmul.f32 %v402_v49, %v331_v8 }
 0x3dd   :  { %v397_v47 = vpop.permute.xlu1 %396 }
 0x3de   :  { %v404_v48 = vmul.f32 %v397_v47, %v330_v3 }
 0x3e0   :  { %457 = vmatmul.msk.f32.vlgmr.msrb.gmra.mxu3 %vm309_vm13, %v404_v48 }
 0x3e8   :  { %458 = vmatmul.msk.f32.gmra.mxu3 %vm309_vm13, %v405_v50 }
 0x463   :  { %v430_v52 = vpop.f32.mrf.mxu3 }
 0x464   :  { %v431_v53 = vadd.f32 %v470_v51, %v430_v52 }
 0x466   :  { %v436_v54 = vmul.f32 %v431_v53, %v561_v31 }
 0x468   :  { %v438_v55 = vadd.f32 %v436_v54, %v553_v6 }
 0x46a   :  { %440 = vst [vmem:[%s607_s2] sm:$0xff] %v438_v55 }
 0x46b   :  { %v433_v56 = vpop.f32.mrf.mxu3 }
 0x46c   :  { %v434_v57 = vadd.f32 %v470_v51, %v433_v56 }
 0x46e   :  { %v437_v58 = vmul.f32 %v434_v57, %v564_v38 }
 0x470   :  { %v439_v59 = vadd.f32 %v437_v58, %v557_v12 }
 0x472   :  { %441 = vst [vmem:[%s607_s2 + $0x8] sm:$0xff] %v439_v59 }
 0x473   :  { %446 = vsyncpa [#allocation3], 1 }

</bundles_post_ra>
